<compile_context>
chip_gen: v7x
topology: tpu7x:2x2x1
jax: 0.10.0
libtpu: 0.0.40
codegen_flags: <defaults>
</compile_context>

<pallas_src>
import functools

import jax
import jax.numpy as jnp
from jax.experimental import pallas as pl
from jax.experimental.pallas import tpu as pltpu


def _encode_a_kernel(x_ref, m1_ref, b1_ref, m2_ref, b2_ref, o_ref, h1_ref,
                     *, B, H, W, d, cout, hpool, A, S):
    # x_ref  : (B, H+2d, W*Cin_pad) bf16   per-image d-row zero halo
    # m1_ref : (3*W*Cin_pad, W*Cout) bf16  K-stacked conv1 band matrices
    # b1_ref : (1, W*Cout) f32             folded conv1+BN1 bias (tiled over W)
    # m2_ref : (3*W*Cout, W*Cout) bf16     K-stacked conv2 band matrices
    # b2_ref : (1, W*Cout) f32
    # o_ref  : (B, hpool, W*Cout) f32      lane-dense output (odd-w blocks junk)
    # h1_ref : (B*S, W*Cout) bf16 scratch  per image: data rows [A, A+H),
    #                                      zero halo rows around them.
    WC = W * cout
    f32 = jnp.float32

    # Zero the halo regions of the h1 scratch.  Done every step (cheap: two
    # tile-aligned stores per image) so it is correct even when the grid is
    # sharded across TensorCores (scratch is per-core).
    z_top = jnp.zeros((A, WC), h1_ref.dtype)
    z_bot = jnp.zeros((S - A - H, WC), h1_ref.dtype)
    for b in range(B):
        h1_ref[pl.ds(b * S, A), :] = z_top
        h1_ref[pl.ds(b * S + A + H, S - A - H), :] = z_bot

    # ---- conv1_1 + folded bn1_1 + relu: single K-fused bf16 matmul over the
    #      whole image block (M = B*H, K = 3*W*Cin_pad, N = W*Cout).
    lhs1 = jnp.concatenate(
        [jnp.concatenate([x_ref[b, pl.ds(kh * d, H), :] for kh in range(3)],
                         axis=-1)
         for b in range(B)], axis=0)
    acc1 = jnp.dot(lhs1, m1_ref[...], preferred_element_type=f32)
    h1 = jnp.maximum(acc1 + b1_ref[...], 0.0).astype(h1_ref.dtype)
    for b in range(B):                       # data rows land tile-aligned
        h1_ref[pl.ds(b * S + A, H), :] = h1[b * H:(b + 1) * H, :]

    # ---- conv1_2 + folded bn1_2 + relu: the scratch halo rows provide conv2's
    #      zero padding in H.  (M = B*H, K = 3*W*Cout, N = W*Cout)
    lhs2 = jnp.concatenate(
        [jnp.concatenate([h1_ref[pl.ds(b * S + A - d + kh * d, H), :]
                          for kh in range(3)], axis=-1)
         for b in range(B)], axis=0)
    acc2 = jnp.dot(lhs2, m2_ref[...], preferred_element_type=f32)
    h2 = jnp.maximum(acc2 + b2_ref[...], 0.0)          # (B*H, WC) f32

    # ---- maxpool 2x2 stride 2.
    # rows: pairwise max (pairs never cross images since H is even).
    hh = h2.reshape(B * hpool, 2, WC)
    g = jnp.maximum(hh[:, 0, :], hh[:, 1, :])          # (B*hpool, WC)
    # cols: bring the (w+1) channel-block next to w via an XLU roll and take
    # the max; even-w blocks now hold the pooled values, odd-w blocks are
    # garbage and are dropped in the wrapper -> the store stays 128-lane dense.
    rolled = pltpu.roll(g, (W - 1) * cout, 1)
    pooled = jnp.maximum(g, rolled)
    o_ref[...] = pooled.reshape(B, hpool, WC).astype(o_ref.dtype)


def _fold_bn(w, b, gamma, beta, mean, var, eps=1e-5):
    """Fold inference BatchNorm into the preceding conv weight / bias."""
    scale = gamma / jnp.sqrt(var + eps)
    w_f = (w * scale[:, None, None, None]).astype(jnp.float32)
    b_f = ((b - mean) * scale + beta).astype(jnp.float32)
    return w_f, b_f


def _band_matrices(w_f, W, d, cin_pad):
    """(Cout, Cin, 3, 3) folded weight -> K-stacked (3*W*cin_pad, W*Cout) bf16.

    M[kh][a*cin_pad + c, j*Cout + o] = w_f[o, c, kh, kw] with a = j + (kw-1)*d,
    summed over kw; out-of-range taps are dropped (zero padding in W).
    """
    cout, cin = w_f.shape[0], w_f.shape[1]
    mats = []
    for kh in range(3):
        m = jnp.zeros((W * cin_pad, W * cout), jnp.float32)
        for kw in range(3):
            shift_eye = jnp.eye(W, W, k=-(kw - 1) * d, dtype=jnp.float32)
            tap = jnp.zeros((cin_pad, cout), jnp.float32).at[:cin, :].set(
                w_f[:, :, kh, kw].T)
            m = m + jnp.kron(shift_eye, tap)
        mats.append(m)
    return jnp.concatenate(mats, axis=0).astype(jnp.bfloat16)


def _choose_cin_pad(W, cin, lane=128):
    """Smallest (bounded) channel pad making W*cin a multiple of 128 lanes."""
    for c in range(cin, 2 * cin + 9):
        if (W * c) % lane == 0:
            return c
    return cin


def encode_a_forward(x_nchw, params, *, dilation=1, conv_grid=(1, 1),
                     block_images=None):
    """Inference forward of Encode_A. (N, Cin, H, W) -> (N, Cout, H/2, W/2)."""
    d = int(dilation * conv_grid[0])
    n, cin, H, W = x_nchw.shape
    cout = params["w1"].shape[0]
    assert H % 2 == 0 and W % 2 == 0, "odd spatial dims not supported"
    # TODO(synk): ceil_mode max-pool for odd H/W, training-mode BatchNorm
    # (batch statistics) and training-mode Dropout2d (random channel zeroing)
    # are not implemented; inference/eval semantics are used.
    hpool, wpool = H // 2, W // 2

    # Images per grid step: amortize per-step overhead / fill the MXU M dim,
    # but keep >= 2 grid steps so multi-TensorCore chips shard the batch.
    if block_images is None:
        B = max(1, min(8, -(-n // 2)))
    else:
        B = max(1, min(int(block_images), n))
    n_pad = -(-n // B) * B

    cin_pad = _choose_cin_pad(W, cin)

    w1f, b1f = _fold_bn(params["w1"], params["b1"], params["g1"],
                        params["be1"], params["m1"], params["v1"])
    w2f, b2f = _fold_bn(params["w2"], params["b2"], params["g2"],
                        params["be2"], params["m2"], params["v2"])

    m1 = _band_matrices(w1f, W, d, cin_pad)        # (3*W*cin_pad, W*cout) bf16
    m2 = _band_matrices(w2f, W, d, cout)           # (3*W*cout,   W*cout) bf16
    b1_lane = jnp.tile(b1f, W)[None, :]            # (1, W*cout) f32
    b2_lane = jnp.tile(b2f, W)[None, :]

    # NHWC, d-row zero halo per image, zero-pad channels to a lane-friendly
    # count, merge W and C into the lane dim, bf16 matmul operand, pad batch.
    x_nhwc = jnp.transpose(x_nchw, (0, 2, 3, 1)).astype(jnp.float32)
    x_pad = jnp.pad(x_nhwc,
                    ((0, n_pad - n), (d, d), (0, 0), (0, cin_pad - cin)))
    x2d = x_pad.reshape(n_pad, H + 2 * d, W * cin_pad).astype(jnp.bfloat16)

    # h1 scratch layout: per image S rows; data rows tile-aligned at offset A
    # with a zeroed d-row halo on each side (conv2's zero padding in H).
    A = ((d + 15) // 16) * 16
    S = ((A + H + d + 15) // 16) * 16

    kern = functools.partial(_encode_a_kernel, B=B, H=H, W=W, d=d, cout=cout,
                             hpool=hpool, A=A, S=S)

    flops = (2 * n_pad * H * (3 * W * cin_pad) * (W * cout)
             + 2 * n_pad * H * (3 * W * cout) * (W * cout))
    bytes_accessed = (x2d.size * 2 + m1.size * 2 + m2.size * 2
                      + (b1_lane.size + b2_lane.size) * 4
                      + n_pad * hpool * W * cout * 4)

    out2d = pl.pallas_call(
        kern,
        out_shape=jax.ShapeDtypeStruct((n_pad, hpool, W * cout), jnp.float32),
        grid=(n_pad // B,),
        in_specs=[
            pl.BlockSpec((B, H + 2 * d, W * cin_pad), lambda i: (i, 0, 0)),
            pl.BlockSpec((3 * W * cin_pad, W * cout), lambda i: (0, 0)),
            pl.BlockSpec((1, W * cout), lambda i: (0, 0)),
            pl.BlockSpec((3 * W * cout, W * cout), lambda i: (0, 0)),
            pl.BlockSpec((1, W * cout), lambda i: (0, 0)),
        ],
        out_specs=pl.BlockSpec((B, hpool, W * cout), lambda i: (i, 0, 0)),
        scratch_shapes=[pltpu.VMEM((B * S, W * cout), jnp.bfloat16)],
        compiler_params=pltpu.CompilerParams(
            dimension_semantics=("parallel",),
            vmem_limit_bytes=16 * 1024 * 1024,
        ),
        cost_estimate=pl.CostEstimate(flops=int(flops), transcendentals=0,
                                      bytes_accessed=int(bytes_accessed)),
    )(x2d, m1, b1_lane, m2, b2_lane)

    # Drop batch padding and the odd-w (garbage) lane blocks, back to NCHW.
    out = out2d[:n].reshape(n, hpool, W, cout)[:, :, 0::2, :]
    return jnp.transpose(out, (0, 3, 1, 2))


def _reference(x, params, d):
    """Pure-JAX reference: conv-bn-relu x2 + maxpool 2x2 (eval-mode module)."""
    def conv_bn_relu(h, w, b, g, be, m, v):
        y = jax.lax.conv_general_dilated(
            h, w, window_strides=(1, 1),
            padding=((d, d), (d, d)), rhs_dilation=(d, d),
            dimension_numbers=("NCHW", "OIHW", "NCHW"))
        y = y + b[None, :, None, None]
        scale = g / jnp.sqrt(v + 1e-5)
        y = scale[None, :, None, None] * (y - m[None, :, None, None]) \
            + be[None, :, None, None]
        return jnp.maximum(y, 0.0)

    h = conv_bn_relu(x, params["w1"], params["b1"], params["g1"],
                     params["be1"], params["m1"], params["v1"])
    h = conv_bn_relu(h, params["w2"], params["b2"], params["g2"],
                     params["be2"], params["m2"], params["v2"])
    return jax.lax.reduce_window(h, -jnp.inf, jax.lax.max,
                                 (1, 1, 2, 2), (1, 1, 2, 2), "VALID")


if __name__ == "__main__":
    in_c, out_c = 4, 8
    H = W = 16
    n_max = 5

    key = jax.random.PRNGKey(0)
    ks = jax.random.split(key, 11)
    x_all = jax.random.normal(ks[0], (n_max, in_c, H, W), jnp.float32)
    params = {
        "w1": jax.random.normal(ks[1], (out_c, in_c, 3, 3), jnp.float32) * 0.3,
        "b1": jax.random.normal(ks[2], (out_c,), jnp.float32) * 0.1,
        "g1": 1.0 + 0.1 * jax.random.normal(ks[3], (out_c,), jnp.float32),
        "be1": 0.1 * jax.random.normal(ks[4], (out_c,), jnp.float32),
        "m1": 0.1 * jax.random.normal(ks[5], (out_c,), jnp.float32),
        "v1": 0.5 + jax.random.uniform(ks[6], (out_c,), jnp.float32),
        "w2": jax.random.normal(ks[7], (out_c, out_c, 3, 3), jnp.float32) * 0.3,
        "b2": jax.random.normal(ks[8], (out_c,), jnp.float32) * 0.1,
        "g2": 1.0 + 0.1 * jax.random.normal(ks[9], (out_c,), jnp.float32),
        "be2": 0.1 * jax.random.normal(ks[10], (out_c,), jnp.float32),
        "m2": 0.05 * jnp.ones((out_c,), jnp.float32),
        "v2": 0.8 * jnp.ones((out_c,), jnp.float32),
    }

    # n=2 exercises the B=1 / 2-step path; n=5 exercises multi-image blocks
    # (B=3) plus batch padding.  Both the default dilation and a dilated
    # variant (dilation*grid[0] = 2) are checked against the f32 reference
    # (bf16 matmul operands -> relaxed tolerance).
    for n in (2, 5):
        x = x_all[:n]
        for dilation, gr in ((1, (1, 1)), (2, (1, 1))):
            out = encode_a_forward(x, params, dilation=dilation, conv_grid=gr)
            out = jax.block_until_ready(out)
            ref = _reference(x, params, dilation * gr[0])
            assert out.shape == ref.shape, (out.shape, ref.shape)
            err = float(jnp.max(jnp.abs(out - ref)))
            assert jnp.allclose(out, ref, atol=1e-1, rtol=5e-2), err

    print("KERNEL_OK")
</pallas_src>

<mosaic_0001>
module attributes {stable_mosaic.version = 11 : i64} {
  func.func @_encode_a_kernel(%arg0: i32, %arg1: memref<1x18x128xbf16, #tpu.memory_space<vmem>>, %arg2: memref<384x128xbf16, #tpu.memory_space<vmem>>, %arg3: memref<1x128xf32, #tpu.memory_space<vmem>>, %arg4: memref<384x128xbf16, #tpu.memory_space<vmem>>, %arg5: memref<1x128xf32, #tpu.memory_space<vmem>>, %arg6: memref<1x8x128xf32, #tpu.memory_space<vmem>>, %arg7: memref<48x128xbf16, #tpu.memory_space<vmem>>) attributes {dimension_semantics = [#tpu.dimension_semantics<parallel>], iteration_bounds = array<i64: 2>, scalar_prefetch = 0 : i64, scratch_operands = 1 : i64, tpu.core_type = #tpu.core_type<tc>, window_params = [{transform_indices = @transform_0, window_bounds = array<i64: 1, 18, 128>}, {pipeline_mode = #tpu.pipeline_mode<synchronous>, transform_indices = @transform_1, window_bounds = array<i64: 384, 128>}, {pipeline_mode = #tpu.pipeline_mode<synchronous>, transform_indices = @transform_2, window_bounds = array<i64: 1, 128>}, {pipeline_mode = #tpu.pipeline_mode<synchronous>, transform_indices = @transform_3, window_bounds = array<i64: 384, 128>}, {pipeline_mode = #tpu.pipeline_mode<synchronous>, transform_indices = @transform_4, window_bounds = array<i64: 1, 128>}, {transform_indices = @transform_5, window_bounds = array<i64: 1, 8, 128>}]} {
    %cst = arith.constant 0.000000e+00 : bf16
    %0 = vector.broadcast %cst : bf16 to vector<16x128xbf16>
    %cst_0 = arith.constant 0.000000e+00 : bf16
    %1 = vector.broadcast %cst_0 : bf16 to vector<16x128xbf16>
    %c0 = arith.constant 0 : index
    %c0_1 = arith.constant 0 : index
    %2 = vector.load %arg7[%c0, %c0_1] : memref<48x128xbf16, #tpu.memory_space<vmem>>, vector<16x128xbf16>
    tpu.vector_store %arg7[%c0, %c0_1], %0 {strides = array<i32>} : memref<48x128xbf16, #tpu.memory_space<vmem>>, vector<16x128xbf16>,
    %c32 = arith.constant 32 : index
    %c0_2 = arith.constant 0 : index
    %3 = vector.load %arg7[%c32, %c0_2] : memref<48x128xbf16, #tpu.memory_space<vmem>>, vector<16x128xbf16>
    tpu.vector_store %arg7[%c32, %c0_2], %1 {strides = array<i32>} : memref<48x128xbf16, #tpu.memory_space<vmem>>, vector<16x128xbf16>,
    %c0_3 = arith.constant 0 : index
    %c0_4 = arith.constant 0 : index
    %c0_5 = arith.constant 0 : index
    %4 = vector.load %arg1[%c0_3, %c0_4, %c0_5] : memref<1x18x128xbf16, #tpu.memory_space<vmem>>, vector<1x16x128xbf16>
    %5 = vector.shape_cast %4 : vector<1x16x128xbf16> to vector<16x128xbf16>
    %c0_6 = arith.constant 0 : index
    %c1 = arith.constant 1 : index
    %c0_7 = arith.constant 0 : index
    %6 = vector.load %arg1[%c0_6, %c1, %c0_7] : memref<1x18x128xbf16, #tpu.memory_space<vmem>>, vector<1x16x128xbf16>
    %7 = vector.shape_cast %6 : vector<1x16x128xbf16> to vector<16x128xbf16>
    %c0_8 = arith.constant 0 : index
    %c2 = arith.constant 2 : index
    %c0_9 = arith.constant 0 : index
    %8 = vector.load %arg1[%c0_8, %c2, %c0_9] : memref<1x18x128xbf16, #tpu.memory_space<vmem>>, vector<1x16x128xbf16>
    %9 = vector.shape_cast %8 : vector<1x16x128xbf16> to vector<16x128xbf16>
    %10 = tpu.concatenate %5, %7, %9 in 1 : vector<16x128xbf16>, vector<16x128xbf16>, vector<16x128xbf16> -> vector<16x384xbf16>
    %c0_10 = arith.constant 0 : index
    %c0_11 = arith.constant 0 : index
    %11 = vector.load %arg2[%c0_10, %c0_11] : memref<384x128xbf16, #tpu.memory_space<vmem>>, vector<384x128xbf16>
    %cst_12 = arith.constant dense<0.000000e+00> : vector<16x128xf32>
    %12 = tpu.matmul %10, %11, %cst_12 {dimension_numbers = #tpu.dot_dimension_numbers<[1], [0], [0], [1], [0, 0, 1, 1], [], []>} : vector<16x384xbf16>, vector<384x128xbf16>, vector<16x128xf32> -> vector<16x128xf32>
    %c0_13 = arith.constant 0 : index
    %c0_14 = arith.constant 0 : index
    %13 = vector.load %arg3[%c0_13, %c0_14] : memref<1x128xf32, #tpu.memory_space<vmem>>, vector<1x128xf32>
    %14 = vector.broadcast %13 : vector<1x128xf32> to vector<16x128xf32>
    %15 = arith.addf %12, %14 : vector<16x128xf32>
    %cst_15 = arith.constant 0.000000e+00 : f32
    %16 = vector.broadcast %cst_15 : f32 to vector<16x128xf32>
    %17 = arith.maximumf %15, %16 : vector<16x128xf32>
    %18 = arith.truncf %17 : vector<16x128xf32> to vector<16x128xbf16>
    %c16 = arith.constant 16 : index
    %c0_16 = arith.constant 0 : index
    %19 = vector.load %arg7[%c16, %c0_16] : memref<48x128xbf16, #tpu.memory_space<vmem>>, vector<16x128xbf16>
    tpu.vector_store %arg7[%c16, %c0_16], %18 {strides = array<i32>} : memref<48x128xbf16, #tpu.memory_space<vmem>>, vector<16x128xbf16>,
    %c15 = arith.constant 15 : index
    %c0_17 = arith.constant 0 : index
    %20 = vector.load %arg7[%c15, %c0_17] : memref<48x128xbf16, #tpu.memory_space<vmem>>, vector<16x128xbf16>
    %c16_18 = arith.constant 16 : index
    %c0_19 = arith.constant 0 : index
    %21 = vector.load %arg7[%c16_18, %c0_19] : memref<48x128xbf16, #tpu.memory_space<vmem>>, vector<16x128xbf16>
    %c17 = arith.constant 17 : index
    %c0_20 = arith.constant 0 : index
    %22 = vector.load %arg7[%c17, %c0_20] : memref<48x128xbf16, #tpu.memory_space<vmem>>, vector<16x128xbf16>
    %23 = tpu.concatenate %20, %21, %22 in 1 : vector<16x128xbf16>, vector<16x128xbf16>, vector<16x128xbf16> -> vector<16x384xbf16>
    %c0_21 = arith.constant 0 : index
    %c0_22 = arith.constant 0 : index
    %24 = vector.load %arg4[%c0_21, %c0_22] : memref<384x128xbf16, #tpu.memory_space<vmem>>, vector<384x128xbf16>
    %cst_23 = arith.constant dense<0.000000e+00> : vector<16x128xf32>
    %25 = tpu.matmul %23, %24, %cst_23 {dimension_numbers = #tpu.dot_dimension_numbers<[1], [0], [0], [1], [0, 0, 1, 1], [], []>} : vector<16x384xbf16>, vector<384x128xbf16>, vector<16x128xf32> -> vector<16x128xf32>
    %c0_24 = arith.constant 0 : index
    %c0_25 = arith.constant 0 : index
    %26 = vector.load %arg5[%c0_24, %c0_25] : memref<1x128xf32, #tpu.memory_space<vmem>>, vector<1x128xf32>
    %27 = vector.broadcast %26 : vector<1x128xf32> to vector<16x128xf32>
    %28 = arith.addf %25, %27 : vector<16x128xf32>
    %cst_26 = arith.constant 0.000000e+00 : f32
    %29 = vector.broadcast %cst_26 : f32 to vector<16x128xf32>
    %30 = arith.maximumf %28, %29 : vector<16x128xf32>
    %31 = vector.shape_cast %30 : vector<16x128xf32> to vector<8x2x128xf32>
    %32 = vector.extract_strided_slice %31 {offsets = [0, 0, 0], sizes = [8, 1, 128], strides = [1, 1, 1]} : vector<8x2x128xf32> to vector<8x1x128xf32>
    %33 = vector.shape_cast %32 : vector<8x1x128xf32> to vector<8x128xf32>
    %34 = vector.extract_strided_slice %31 {offsets = [0, 1, 0], sizes = [8, 1, 128], strides = [1, 1, 1]} : vector<8x2x128xf32> to vector<8x1x128xf32>
    %35 = vector.shape_cast %34 : vector<8x1x128xf32> to vector<8x128xf32>
    %36 = arith.maximumf %33, %35 : vector<8x128xf32>
    %c120_i32 = arith.constant 120 : i32
    %37 = tpu.dynamic_rotate %36 by %c120_i32 dim 1 : vector<8x128xf32>, i32 -> vector<8x128xf32>
    %38 = arith.maximumf %36, %37 : vector<8x128xf32>
    %39 = vector.shape_cast %38 : vector<8x128xf32> to vector<1x8x128xf32>
    %c0_27 = arith.constant 0 : index
    %c0_28 = arith.constant 0 : index
    %c0_29 = arith.constant 0 : index
    %40 = vector.load %arg6[%c0_27, %c0_28, %c0_29] : memref<1x8x128xf32, #tpu.memory_space<vmem>>, vector<1x8x128xf32>
    tpu.vector_store %arg6[%c0_27, %c0_28, %c0_29], %39 {strides = array<i32>} : memref<1x8x128xf32, #tpu.memory_space<vmem>>, vector<1x8x128xf32>,
    return
  }
  func.func @transform_0(%arg0: i32) -> (i32, i32, i32) {
    %c0_i32 = arith.constant 0 : i32
    %c0_i32_0 = arith.constant 0 : i32
    %c0_i32_1 = arith.constant 0 : i32
    return %arg0, %c0_i32, %c0_i32_0 : i32, i32, i32
  }
  func.func @transform_1(%arg0: i32) -> (i32, i32) {
    %c0_i32 = arith.constant 0 : i32
    %c0_i32_0 = arith.constant 0 : i32
    %c0_i32_1 = arith.constant 0 : i32
    return %c0_i32, %c0_i32_0 : i32, i32
  }
  func.func @transform_2(%arg0: i32) -> (i32, i32) {
    %c0_i32 = arith.constant 0 : i32
    %c0_i32_0 = arith.constant 0 : i32
    %c0_i32_1 = arith.constant 0 : i32
    return %c0_i32, %c0_i32_0 : i32, i32
  }
  func.func @transform_3(%arg0: i32) -> (i32, i32) {
    %c0_i32 = arith.constant 0 : i32
    %c0_i32_0 = arith.constant 0 : i32
    %c0_i32_1 = arith.constant 0 : i32
    return %c0_i32, %c0_i32_0 : i32, i32
  }
  func.func @transform_4(%arg0: i32) -> (i32, i32) {
    %c0_i32 = arith.constant 0 : i32
    %c0_i32_0 = arith.constant 0 : i32
    %c0_i32_1 = arith.constant 0 : i32
    return %c0_i32, %c0_i32_0 : i32, i32
  }
  func.func @transform_5(%arg0: i32) -> (i32, i32, i32) {
    %c0_i32 = arith.constant 0 : i32
    %c0_i32_0 = arith.constant 0 : i32
    %c0_i32_1 = arith.constant 0 : i32
    return %arg0, %c0_i32, %c0_i32_0 : i32, i32, i32
  }
}

</mosaic_0001>

<bundles_post_ra>
// kernel: tpu_custom_call.1
= control target key start
LH: loop header
LB: loop body
LE: loop exit
PB: predicated region body
PF: predicated region fallthrough
CT: control target
= control target key end

     0   :  { %10 = vsyncpa [#allocation4], 0  ;;  %s1926_s0 = inlined_call_operand.vmem [shape: bf16[2,18,128], index: 0, kind: input, shape index: {}]   ;;  %s1927_s1 = inlined_call_operand.hbm [shape: bf16[384,128], index: 1, kind: input, shape index: {}]   ;;  %s1928_s2 = inlined_call_operand.vmem [shape: f32[1,128], index: 2, kind: input, shape index: {}]   ;;  %s1929_s3 = inlined_call_operand.hbm [shape: bf16[384,128], index: 3, kind: input, shape index: {}]   ;;  %s1930_s4 = inlined_call_operand.vmem [shape: f32[1,128], index: 4, kind: input, shape index: {}]   ;;  %s1931_s5 = inlined_call_operand.hbm [shape: f32[2,8,128], index: 5, kind: output, shape index: {}]  }
   0x1   :  { %11 = vsyncpa [#allocation7], 0 }
   0x2   :  { %12 = vsyncpa [#allocation5], 0 }
   0x3   :  { %14 = vsyncpa [#allocation5 + $0x1], 0  ;;  %s1689_s18 = smov 0   ;;  %s1691_s19 = smov 0  }
   0x4   :  { %s1693_s20 = smov 0   ;;  %s1695_s21 = smov 0  }
   0x5 LB: > { %s1710_s22 = sadd.s32 4294967295, %s1647_s21   ;;  %s1225_s23 = sadd.s32 4294967294, %s1647_s21   ;;  %s1647_s21 = sphi %s1695_s21, %s1949_s21   ;;  %s1643_s20 = sphi %s1693_s20, %s1948_s20   ;;  %s1639_s19 = sphi %s1691_s19, %s1947_s19   ;;  %s1635_s18 = sphi %s1689_s18, %s1946_s18  }
   0x6   : > { %s1714_s24 = sadd.s32 1, %s1647_s21   ;;  %s137_s25 = sadd.s32 1, %s1643_s20 }
   0x7   : > { %s134_s26 = ssub.s32 %s1647_s21, %s1714_s24  ;;  %p147_p0 = scmp.ne.s32.totalorder %s1643_s20, %s1639_s19 }
   0x8   : > { %p135_p1 = scmp.eq.s32.totalorder %s134_s26, 0  ;;  %p148_p2 = scmp.eq.s32.totalorder %s1710_s22, 1 }
   0x9   : > { %p153_p3 = scmp.ne.s32.totalorder %s1639_s19, %s1635_s18  ;;  %p154_p4 = scmp.eq.s32.totalorder %s1225_s23, 1 }
   0xa   : > { %s1725_s27 = scalar_select %p135_p1, %s1643_s20, %s137_s25  }
   0xb   : > { %p1727_p5 = por %p148_p2, %p147_p0  ;;  %p1731_p6 = por %p154_p4, %p153_p3 }
   0xc   : > { %p1226_p7 = scmp.ge.s32.totalorder %s1647_s21, 1  ;;  %p161_p8 = scmp.lt.s32.totalorder %s1647_s21, 3 }
   0xd   : > { %s1935_s28 = scalar_select %p1727_p5, 1, 0 }
   0xe   : > { %s1936_s29 = scalar_select %p1731_p6, 1, 0 }
   0xf   : > { %p1932_p9 = scmp.eq.s32.totalorder %s1710_s22, 0  ;;  %p1738_p10 = pnand %p1226_p7, %p161_p8 }
  0x10   : > { %s1649_s6 = smov [#allocation3]   ;;  %s1650_s9 = smov [#allocation6]  }
  0x11   : > { %s1937_s30 = scalar_select %p1738_p10, 1, 0 }
  0x12   : > { %s173_s7 = sshll.u32 %s1649_s6, 4  ;;  %p1413_p11 = pneg %p1738_p10  ;;  %s174_s7 = int_to_ptr.vmem [resolvable:$true] %s173_s7 }
  0x13   : > { %s189_s10 = sshll.u32 %s1650_s9, 4  ;;  %s1521_s13 = scalar_lea.hbm %s1927_s1, 3072  ;;  %s1750_s10 = int_to_ptr.vmem [resolvable:$true] %s189_s10 }
  0x14   : > { %p1746_p12 = pnand %p1932_p9, %p1413_p11  ;;  %p1522_p13 = scmp.ne.s32.totalorder %s1927_s1, %s1521_s13 }
  0x15   : > { %p1528_p3 = scmp.lt.u32.totalorder %s1521_s13, %s1927_s1 }
  0x16   : > { %p1523_p0 = pneg %p1746_p12 }
  0x18   : > { %p1524_p1 = pnand %p1523_p0, %p1522_p13 }
  0x1a   : > { %p1525_p2 = pneg %p1524_p1 }
  0x1c   : > { %p1530_p4 = pnand %p1528_p3, %p1525_p2 }
  0x1e   : > { %1533 = shalt.err (!%p1530_p4)
}
  0x1f   : > { %s1534_s23 = scalar_lea.vmem %s174_s7, 3072  ;;  %p1542_p9 = scmp.lt.s32.totalorder %s174_s7, %s174_s7 }
  0x20   : > { %p1535_p7 = scmp.ne.s32.totalorder %s174_s7, %s1534_s23  ;;  %p1543_p6 = scmp.lt.s32.totalorder %s1534_s23, %s1534_s23 }
  0x22   : > { %p1537_p8 = pnand %p1535_p7, %p1523_p0  ;;  %p1544_p5 = por %p1543_p6, %p1542_p9 }
  0x24   : > { %p1538_p11 = pneg %p1537_p8 }
  0x26   : > { %p1545_p10 = pnand %p1544_p5, %p1538_p11 }
  0x28   : > { %1548 = shalt.err (!%p1545_p10)
}
  0x29   : > { %s1651_s25 = smov 64   ;;  %s1652_s26 = smov 4  }
  0x2a   : > { %1416 = dma.hbm_to_vmem [thread:$0]  (!%p1746_p12), %s1927_s1, 3072, %s174_s7, [#allocation4], %s1651_s25, %s1651_s25, %s1652_s26  }
  0x2b   : > { %s1549_s13 = scalar_lea.hbm %s1929_s3, 3072 }
  0x2c   : > { %p1550_p13 = scmp.ne.s32.totalorder %s1929_s3, %s1549_s13  ;;  %p1556_p9 = scmp.lt.u32.totalorder %s1549_s13, %s1929_s3 }
  0x2e   : > { %p1552_p5 = pnand %p1550_p13, %p1523_p0 }
  0x30   : > { %p1553_p6 = pneg %p1552_p5 }
  0x32   : > { %p1558_p10 = pnand %p1556_p9, %p1553_p6 }
  0x34   : > { %1561 = shalt.err (!%p1558_p10)
}
  0x35   : > { %s1562_s7 = scalar_lea.vmem %s1750_s10, 3072  ;;  %p1570_p4 = scmp.lt.s32.totalorder %s1750_s10, %s1750_s10 }
  0x36   : > { %p1563_p1 = scmp.ne.s32.totalorder %s1750_s10, %s1562_s7  ;;  %p1571_p7 = scmp.lt.s32.totalorder %s1562_s7, %s1562_s7 }
  0x38   : > { %p1565_p2 = pnand %p1563_p1, %p1523_p0  ;;  %p1572_p8 = por %p1571_p7, %p1570_p4 }
  0x3a   : > { %p1566_p3 = pneg %p1565_p2 }
  0x3c   : > { %p1573_p11 = pnand %p1572_p8, %p1566_p3 }
  0x3e   : > { %1576 = shalt.err (!%p1573_p11)
}
  0x3f   : > { %1419 = dma.hbm_to_vmem [thread:$0]  (!%p1746_p12), %s1929_s3, 3072, %s1750_s10, [#allocation7], %s1651_s25, %s1651_s25, %s1652_s26  }
  0x40   : > { %p1939_p13 = scmp.ne.s32.totalorder %s1937_s30, 0 }
  0x41   : > { %p1940_p5 = scmp.eq.s32.totalorder (!%p1939_p13), %s1710_s22, 0 }
  0x42   : > { %216 = sbr.rel (%p1939_p13) target bundleno = 733 (0x2dd), region = 40 }
  0x49   : > { %1622 = dma.done.wait (%p1940_p5), [#allocation4], 3072   ;;  %p1941_p0 = pmov %p1940_p5 }
  0x4b   : > { %1624 = vsyncadd (%p1941_p0), [#allocation4], 4294964224  ;;  %p1942_p6 = pmov %p1941_p0 }
  0x4c   : > { %p1943_p9 = pmov %p1941_p0 }
  0x4d   : > { %1626 = dma.done.wait (%p1942_p6), [#allocation7], 3072  }
  0x4e   : > { %1628 = vsyncadd (%p1943_p9), [#allocation7], 4294964224  ;;  %v1653_v0 = vmov 0.0   ;;  %vm1654_vm0 = vmmov 0   ;;  %v1470_v1 = vld [vmem:[#allocation3 + $0x40] sm:$0xff]   ;;  %v1473_v4 = vld [vmem:[#allocation3 + $0x48] sm:$0xff]  }
  0x4f   : > { %1362 = vmatprep.subr.bf16.mxu1 %v1653_v0  ;;  %1378 = vmatprep.mubr.msk.bf16.mxu1 %vm1654_vm0, %v1653_v0  ;;  %v1471_v2 = vld [vmem:[#allocation3] sm:$0xff]   ;;  %v1474_v5 = vld [vmem:[#allocation3 + $0x8] sm:$0xff]   ;;  %v1476_v7 = vld [vmem:[#allocation3 + $0x50] sm:$0xff]   ;;  %p248_p12 = scmp.lt.s32.totalorder %s1710_s22, 1  ;;  %vm269_vm1 = vsmask.f32 7424 }
  0x50   : > { %1300 = vmatprep.subr.bf16.mxu0 %v1470_v1  ;;  %v1472_v3 = vld [vmem:[#allocation3 + $0x80] sm:$0xff]   ;;  %v1475_v6 = vld [vmem:[#allocation3 + $0x88] sm:$0xff]   ;;  %v1477_v8 = vld [vmem:[#allocation3 + $0x10] sm:$0xff]   ;;  %vm286_vm2 = vcmask 1046528   ;;  %v1655_v52 = vmov 0   ;;  %vm1026_vm4 = vcmask 1041409  }
  0x51   : > { %1301 = vmatpush3.bf16.msra.mxu0 %v1471_v2  ;;  %1363 = vmatpush3.bf16.msra.mxu1 %v1472_v3  ;;  %v1478_v9 = vld [vmem:[#allocation3 + $0x90] sm:$0xff]   ;;  %v1479_v10 = vld [vmem:[#allocation3 + $0x58] sm:$0xff]   ;;  %v1482_v13 = vld [vmem:[#allocation3 + $0x60] sm:$0xff]   ;;  %s249_s30 = scalar_select %p248_p12, %s1710_s22, 1  ;;  %255 = vst [vmem:[#allocation2 + $0x10] sm:$0xff] %v1655_v52  ;;  %vm1028_vm5 = vcmask 1042434  }
  0x52   : > { %1302 = vmatprep.subr.bf16.mxu0 %v1473_v4  ;;  %1364 = vmatprep.subr.bf16.mxu1 %v1653_v0  ;;  %v1480_v11 = vld [vmem:[#allocation3 + $0x18] sm:$0xff]   ;;  %v1483_v14 = vld [vmem:[#allocation3 + $0x20] sm:$0xff]   ;;  %v1485_v16 = vld [vmem:[#allocation3 + $0x68] sm:$0xff]   ;;  %254 = vst [vmem:[#allocation2] sm:$0xff] %v1655_v52  ;;  %vm647_vm3 = vsmask.f32 256 }
  0x53   : > { %v1481_v12 = vld [vmem:[#allocation3 + $0x98] sm:$0xff]   ;;  %v1484_v15 = vld [vmem:[#allocation3 + $0xa0] sm:$0xff]   ;;  %s1402_s8 = smul.u32 12, %s249_s30  ;;  %v1486_v17 = vld [vmem:[#allocation3 + $0x28] sm:$0xff]   ;;  %vm1030_vm6 = vcmask 1043459   ;;  %vm1032_vm7 = vcmask 1044484  }
  0x54   : > { %v1487_v18 = vld [vmem:[#allocation3 + $0xa8] sm:$0xff]   ;;  %v1488_v19 = vld [vmem:[#allocation3 + $0x70] sm:$0xff]   ;;  %v1491_v24 = vld [vmem:[#allocation3 + $0x78] sm:$0xff]   ;;  %vm1034_vm8 = vcmask 1045509   ;;  %vm1036_vm9 = vcmask 1046534   ;;  %vm1038_vm10 = vcmask 1047559  }
  0x55   : > { %1303 = vmatpush3.bf16.msra.mxu0 %v1474_v5  ;;  %1365 = vmatpush3.bf16.msra.mxu1 %v1475_v6  ;;  %s252_s26 = scalar_lea.vmem %s1926_s0, %s1402_s8  ;;  %v1489_v20 = vld [vmem:[#allocation3 + $0x30] sm:$0xff]   ;;  %v1492_v28 = vld [vmem:[#allocation3 + $0x38] sm:$0xff]   ;;  %v1497_v41 = vld [vmem:[#allocation6 + $0x80] sm:$0xff]   ;;  %s1657_s14 = smov 120  }
  0x56   : > { %1304 = vmatprep.subr.bf16.mxu0 %v1476_v7  ;;  %1366 = vmatprep.subr.bf16.mxu1 %v1653_v0  ;;  %v1490_v21 = vld [vmem:[#allocation3 + $0xb0] sm:$0xff]   ;;  %v256_v22 = vld [vmem:[%s252_s26] sm:$0xf]  ;;  %v257_v23 = vld [vmem:[%s252_s26 + $0x4] sm:$0xf]  ;;  %s245_s15 = sand.u32 1, %s1639_s19  }
  0x57   : > { %v1235_v25 = vcombine.low %v256_v22, %v257_v23  ;;  %v1494_v26 = vld [vmem:[%s252_s26 + $0x8] ss:$0 sps:$4 sm:$0x11]   ;;  %v259_v27 = vld [vmem:[%s252_s26] sm:$0xe]  ;;  %v1495_v33 = vld [vmem:[#allocation3 + $0xb8] sm:$0xff]  }
  0x58   : > { %v278_v31 = vshll.u32 %v1494_v26, 16  ;;  %v1237_v32 = vcombine.low %v259_v27, %v257_v23  ;;  %v288_v37 = vrot.slane %v1494_v26, 1  ;;  %v1498_v42 = vld [vmem:[#allocation6 + $0x40] sm:$0xff]   ;;  %v1500_v44 = vld [vmem:[#allocation6 + $0x88] sm:$0xff]   ;;  %v1503_v47 = vld [vmem:[#allocation6 + $0x90] sm:$0xff]   ;;  %s1233_s16 = sshll.u32 %s245_s15, 3 }
  0x59   : > { %1305 = vmatpush3.bf16.msra.mxu0 %v1477_v8  ;;  %1367 = vmatpush3.bf16.msra.mxu1 %v1478_v9  ;;  %v271_v29 = vshrl.u32 %v1235_v25, 16  ;;  %v273_v30 = vshll.u32 %v1235_v25, 16  ;;  %v1499_v43 = vld [vmem:[#allocation6] sm:$0xff]   ;;  %v1501_v45 = vld [vmem:[#allocation6 + $0x48] sm:$0xff]   ;;  %v1504_v48 = vld [vmem:[#allocation6 + $0x50] sm:$0xff]   ;;  %s1297_s17 = sshll.u32 %s1710_s22, 7 }
  0x5a   : > { %1306 = vmatprep.subr.bf16.mxu0 %v1479_v10  ;;  %1368 = vmatprep.subr.bf16.mxu1 %v1653_v0  ;;  %v280_v35 = vrot.slane %v278_v31, 1  ;;  %v287_v36 = vrot.slane %v1237_v32, 1  ;;  %v1502_v46 = vld [vmem:[#allocation6 + $0x8] sm:$0xff]   ;;  %v1505_v49 = vld [vmem:[#allocation6 + $0x10] sm:$0xff]   ;;  %v1506_v50 = vld [vmem:[#allocation6 + $0x98] sm:$0xff]   ;;  %s247_s7 = scalar_lea.vmem [#allocation8], %s1233_s16  ;;  %s1881_s8 = scalar_lea.hbm %s1931_s5, %s1297_s17 }
  0x5b   : > { %v275_v34 = vrot.slane %v273_v30, 1  ;;  %v1507_v51 = vld [vmem:[#allocation6 + $0x58] sm:$0xff]   ;;  %v1509_v54 = vld [vmem:[#allocation6 + $0xa0] sm:$0xff]   ;;  %v1512_v57 = vld [vmem:[#allocation6 + $0xa8] sm:$0xff]   ;;  %s1144_s23 = sshll.u32 %s247_s7, 4  ;;  %s1131_s22 = scalar_lea.sflag [#allocation5], %s245_s15  ;;  %s1883_s23 = int_to_ptr.vmem [resolvable:$true] %s1144_s23 }
  0x5c   : > { %v289_v40 = vsel %vm286_vm2, %v287_v36, %v288_v37  ;;  %v1508_v53 = vld [vmem:[#allocation6 + $0x18] sm:$0xff]   ;;  %v1510_v55 = vld [vmem:[#allocation6 + $0x60] sm:$0xff]   ;;  %v1513_v58 = vld [vmem:[#allocation6 + $0x68] sm:$0xff]   ;;  %s1577_s10 = scalar_lea.vmem %s1883_s23, 128  ;;  %p1944_p1 = scmp.ne.s32.totalorder %s1935_s28, 0 }
  0x5d   : > { %1307 = vmatpush3.bf16.msra.mxu0 %v1480_v11  ;;  %1369 = vmatpush3.bf16.msra.mxu1 %v1481_v12  ;;  %v276_v38 = vor.u32 %v275_v34, %v271_v29  ;;  %v1511_v56 = vld [vmem:[#allocation6 + $0x20] sm:$0xff]   ;;  %v1514_v59 = vld [vmem:[#allocation6 + $0x28] sm:$0xff]   ;;  %v1515_v60 = vld [vmem:[#allocation6 + $0xb0] sm:$0xff]   ;;  %p1578_p10 = scmp.ne.s32.totalorder %s1883_s23, %s1577_s10  ;;  %s1658_s25 = smov [#allocation8]  }
  0x5e   : > { %1308 = vmatprep.subr.bf16.mxu0 %v1482_v13  ;;  %1370 = vmatprep.subr.bf16.mxu1 %v1653_v0  ;;  %v1516_v61 = vld [vmem:[#allocation6 + $0x70] sm:$0xff]   ;;  %v1518_v63 = vld [vmem:[#allocation6 + $0xb8] sm:$0xff]   ;;  %v1238_v5 = vld [vmem:[%s1928_s2] ss:$0 sm:$0xff]  ;;  %s1581_s26 = sshll.u32 %s1658_s25, 4  ;;  %s1582_s26 = int_to_ptr.vmem [resolvable:$false] %s1581_s26 }
  0x5f   : > { %v281_v39 = vsel %vm269_vm1, %v276_v38, %v280_v35  ;;  %v1517_v62 = vld [vmem:[#allocation6 + $0x30] sm:$0xff]   ;;  %v1519_v1 = vld [vmem:[#allocation6 + $0x78] sm:$0xff]   ;;  %v576_v27 = vld [vmem:[#allocation2] sm:$0x80]  ;;  %p1579_p2 = pnand %p1578_p10, %p1944_p1  ;;  %s1583_s9 = scalar_lea.vmem %s1582_s26, 256 }
  0x60   : > { %522 = vmatprep.mubr.bf16.mxu0 %v281_v39  ;;  %v1520_v2 = vld [vmem:[#allocation6 + $0x38] sm:$0xff]   ;;  %p1584_p4 = scmp.lt.s32.totalorder %s1883_s23, %s1582_s26  ;;  %p1585_p7 = scmp.lt.s32.totalorder %s1583_s9, %s1577_s10 }
  0x61   : > { %1309 = vmatpush3.bf16.msra.mxu0 %v1483_v14  ;;  %1371 = vmatpush3.bf16.msra.mxu1 %v1484_v15  ;;  %p1580_p3 = pneg %p1579_p2 }
  0x62   : > { %1310 = vmatprep.subr.bf16.mxu0 %v1485_v16  ;;  %1372 = vmatprep.subr.bf16.mxu1 %v1653_v0  ;;  %p1586_p8 = por %p1585_p7, %p1584_p4 }
  0x64   : > { %p1587_p11 = pnand %p1586_p8, %p1580_p3 }
  0x65   : > { %1311 = vmatpush3.bf16.msra.mxu0 %v1486_v17  ;;  %1373 = vmatpush3.bf16.msra.mxu1 %v1487_v18  ;;  %v579_v17 = vld [vmem:[#allocation2 + $0x10] sm:$0x1] }
  0x66   : > { %1312 = vmatprep.subr.bf16.mxu0 %v1488_v19  ;;  %1374 = vmatprep.subr.bf16.mxu1 %v1653_v0 }
  0x69   : > { %1313 = vmatpush3.bf16.msra.mxu0 %v1489_v20  ;;  %1375 = vmatpush3.bf16.msra.mxu1 %v1490_v21  ;;  %v590_v21 = vrot.slane %v579_v17, 1 }
  0x6a   : > { %1314 = vmatprep.subr.bf16.mxu0 %v1491_v24  ;;  %1376 = vmatprep.subr.bf16.mxu1 %v1653_v0 }
  0x6d   : > { %1315 = vmatpush3.bf16.msra.mxu0 %v1492_v28  ;;  %1377 = vmatpush3.bf16.msra.mxu1 %v1495_v33  ;;  %v649_v33 = vshrl.u32 %v576_v27, 16 }
  0x6e   : > { %1382 = vmatprep.subr.bf16.mxu1 %v1653_v0  ;;  %1331 = vmatprep.subr.bf16.mxu0 %v1498_v42 }
  0x6f   : > { %v651_v42 = vrot.slane %v649_v33, 7 }
  0x70   : > { %523 = vmatmul.mubr.bf16.vlgmr.msra.gmra.mrb[0].mxu0 %v1235_v25  ;;  %1379 = vmatmul.mubr.bf16.vlgmr.msra.gmra.mrb[0].mxu1 %v289_v40 }
  0x71   : > { %1398 = vmatprep.mubr.msk.bf16.mxu1 %vm1654_vm0, %v1653_v0  ;;  %1383 = vmatpush3.bf16.msra.mxu1 %v1497_v41 }
  0x72   : > { %1384 = vmatprep.subr.bf16.mxu1 %v1653_v0  ;;  %1332 = vmatpush3.bf16.msra.mxu0 %v1499_v43 }
  0x73   : > { %1333 = vmatprep.subr.bf16.mxu0 %v1501_v45 }
  0x75   : > { %1385 = vmatpush3.bf16.msra.mxu1 %v1500_v44 }
  0x76   : > { %1386 = vmatprep.subr.bf16.mxu1 %v1653_v0  ;;  %1334 = vmatpush3.bf16.msra.mxu0 %v1502_v46 }
  0x77   : > { %1335 = vmatprep.subr.bf16.mxu0 %v1504_v48 }
  0x79   : > { %1387 = vmatpush3.bf16.msra.mxu1 %v1503_v47 }
  0x7a   : > { %1388 = vmatprep.subr.bf16.mxu1 %v1653_v0  ;;  %1336 = vmatpush3.bf16.msra.mxu0 %v1505_v49 }
  0x7b   : > { %1337 = vmatprep.subr.bf16.mxu0 %v1507_v51  ;;  %v1656_v51 = vmov 1983009808  }
  0x7c   : > { %v914_v52 = vunpack.c.l.s4 %v1656_v51 }
  0x7d   : > { %1389 = vmatpush3.bf16.msra.mxu1 %v1506_v50 }
  0x7e   : > { %1390 = vmatprep.subr.bf16.mxu1 %v1653_v0  ;;  %1338 = vmatpush3.bf16.msra.mxu0 %v1508_v53  ;;  %v916_v53 = vlaneseq }
  0x7f   : > { %1339 = vmatprep.subr.bf16.mxu0 %v1510_v55 }
  0x81   : > { %1391 = vmatpush3.bf16.msra.mxu1 %v1509_v54 }
  0x82   : > { %1392 = vmatprep.subr.bf16.mxu1 %v1653_v0  ;;  %1340 = vmatpush3.bf16.msra.mxu0 %v1511_v56  ;;  %v1263_v56 = vld [vmem:[%s1930_s4] ss:$0 sm:$0xff] }
  0x83   : > { %1341 = vmatprep.subr.bf16.mxu0 %v1513_v58 }
  0x85   : > { %1393 = vmatpush3.bf16.msra.mxu1 %v1512_v57 }
  0x86   : > { %1394 = vmatprep.subr.bf16.mxu1 %v1653_v0  ;;  %1342 = vmatpush3.bf16.msra.mxu0 %v1514_v59  ;;  %v915_v59 = vunpack.c.0.s8 %v914_v52 }
  0x87   : > { %1343 = vmatprep.subr.bf16.mxu0 %v1516_v61 }
  0x89   : > { %1395 = vmatpush3.bf16.msra.mxu1 %v1515_v60  ;;  %v917_v60 = vshrl.u32 %v916_v53, 7 }
  0x8a   : > { %1396 = vmatprep.subr.bf16.mxu1 %v1653_v0  ;;  %1344 = vmatpush3.bf16.msra.mxu0 %v1517_v62 }
  0x8b   : > { %1345 = vmatprep.subr.bf16.mxu0 %v1519_v1 }
  0x8d   : > { %1397 = vmatpush3.bf16.msra.mxu1 %v1518_v63 }
  0x8e   : > { %1346 = vmatpush3.bf16.msra.mxu0 %v1520_v2 }
 0x143   : > { %v1316_v3 = vpop.f32.mrb[0].mxu0  ;;  %v565_v6 = vpop.f32.mrb[0].mxu1 }
 0x144   : > { %v1317_v4 = vpop.f32.mrb[1].mxu0  ;;  %v1380_v9 = vpop.f32.mrb[1].mxu1 }
 0x145   : > { %v1318_v7 = vadd.f32 %v1317_v4, %v1316_v3  ;;  %v1319_v8 = vpop.f32.mrb[2].mxu0  ;;  %v568_v11 = vpop.f32.mrb[2].mxu1  ;;  %v918_v3 = vsub.s32 %v915_v59, %v917_v60 }
 0x146   : > { %v1320_v10 = vpop.f32.mrb[3].mxu0  ;;  %v1381_v13 = vpop.f32.mrb[3].mxu1 }
 0x147   : > { %v525_v12 = vadd.f32 %v1318_v7, %v1238_v5  ;;  %v1321_v0 = vadd.f32 %v1320_v10, %v1319_v8  ;;  %v1843_v13 = vsub.s32 0, %v917_v60 }
 0x149   : > { %v566_v14 = vadd.f32 %v565_v6, %v525_v12  ;;  %v528_v15 = vadd.f32 %v1321_v0, %v1238_v5 }
 0x14b   : > { %v569_v16 = vadd.f32 %v568_v11, %v528_v15  ;;  %v572_v18 = vmax.f32 %v566_v14, 0.0 }
 0x14d   : > { %v573_v19 = vmax.f32 %v569_v16, 0.0 }
 0x14f   : > { %v574_v20 = vpack.c.bf16 %v573_v19, %v572_v18 }
 0x151   : > { %v589_v22 = vrot.slane %v574_v20, 1  ;;  %v581_v23 = vshll.u32 %v574_v20, 16  ;;  %v584_v24 = vshrl.u32 %v574_v20, 16 }
 0x153   : > { %v591_v25 = vsel %vm286_vm2, %v589_v22, %v590_v21  ;;  %v583_v26 = vrot.slane %v581_v23, 1  ;;  %v668_v28 = vshrl.u32 %v589_v22, 16  ;;  %v652_v34 = vrot.slane %v584_v24, 7 }
 0x154   : > { %v672_v29 = vshrl.u32 %v591_v25, 16  ;;  %v675_v32 = vshll.u32 %v591_v25, 16 }
 0x155   : > { %v586_v30 = vor.u32 %v584_v24, %v583_v26  ;;  %v656_v35 = vshrl.u32 %v583_v26, 16  ;;  %v670_v37 = vrot.slane %v668_v28, 7  ;;  %v653_v43 = vor.u32 %v652_v34, %v581_v23 }
 0x156   : > { %v674_v31 = vrot.slane %v672_v29, 7 }
 0x157   : > { %v660_v36 = vshrl.u32 %v586_v30, 16  ;;  %v663_v40 = vshll.u32 %v586_v30, 16  ;;  %v658_v44 = vrot.slane %v656_v35, 7  ;;  %v654_v47 = vsel %vm647_vm3, %v651_v42, %v653_v43 }
 0x158   : > { %v677_v38 = vor.u32 %v675_v32, %v674_v31 }
 0x159   : > { %v662_v39 = vrot.slane %v660_v36, 7 }
 0x15a   : > { %v678_v41 = vsel %vm647_vm3, %v670_v37, %v677_v38 }
 0x15b   : > { %1399 = vmatmul.mubr.bf16.vlgmr.msra.gmra.mrb[4].mxu1 %v678_v41  ;;  %v665_v45 = vor.u32 %v663_v40, %v662_v39 }
 0x15d   : > { %v666_v46 = vsel %vm647_vm3, %v658_v44, %v665_v45 }
 0x15e   : > { %858 = vmatprep.mubr.bf16.mxu0 %v666_v46 }
 0x15f   : > { %859 = vmatmul.mubr.bf16.vlgmr.msra.gmra.mrb[4].mxu0 %v654_v47 }
 0x22e   : > { %v901_v48 = vpop.f32.mrb[4].mxu1 }
 0x22f   : > { %v1400_v49 = vpop.f32.mrb[5].mxu1 }
 0x230   : > { %v904_v50 = vpop.f32.mrb[6].mxu1 }
 0x231   : > { %v1401_v54 = vpop.f32.mrb[7].mxu1 }
 0x232   : > { %v1347_v55 = vpop.f32.mrb[4].mxu0 }
 0x233   : > { %v1348_v57 = vpop.f32.mrb[5].mxu0 }
 0x234   : > { %v1349_v58 = vadd.f32 %v1348_v57, %v1347_v55  ;;  %v1350_v61 = vpop.f32.mrb[6].mxu0 }
 0x235   : > { %v1351_v62 = vpop.f32.mrb[7].mxu0 }
 0x236   : > { %v861_v63 = vadd.f32 %v1349_v58, %v1263_v56  ;;  %v1352_v1 = vadd.f32 %v1351_v62, %v1350_v61 }
 0x238   : > { %v902_v2 = vadd.f32 %v901_v48, %v861_v63  ;;  %v864_v4 = vadd.f32 %v1352_v1, %v1263_v56 }
 0x23a   : > { %v908_v5 = vmax.f32 %v902_v2, 0.0  ;;  %v905_v6 = vadd.f32 %v904_v50, %v864_v4 }
 0x23c   : > { %v912_v7 = vcombine.high %v908_v5, %v908_v5  ;;  %v919_v8 = vrot.slane %v908_v5, %v918_v3  ;;  %v909_v9 = vmax.f32 %v905_v6, 0.0 }
 0x23e   : > { %v926_v10 = vrot.slane %v912_v7, %v918_v3  ;;  %v927_v11 = vcombine.high %v919_v8, %v919_v8  ;;  %v1288_v12 = vrot.slane %v919_v8, 9  ;;  %v929_v0 = vcombine.high %v909_v9, %v909_v9 }
 0x23f   : > { %v936_v14 = vrot.slane %v909_v9, %v918_v3 }
 0x240   : > { %v928_v15 = vcombine.high %v926_v10, %v926_v10  ;;  %v1289_v16 = vrot.slane %v927_v11, 9  ;;  %v1290_v17 = vrot.slane %v926_v10, 9  ;;  %v978_v18 = vmax.f32 %v919_v8, %v1288_v12 }
 0x241   : > { %v943_v19 = vrot.slane %v929_v0, %v918_v3  ;;  %v944_v20 = vcombine.high %v936_v14, %v936_v14  ;;  %v1292_v21 = vrot.slane %v936_v14, 9 }
 0x242   : > { %v1291_v22 = vrot.slane %v928_v15, 9  ;;  %v979_v23 = vmax.f32 %v927_v11, %v1289_v16  ;;  %v980_v24 = vmax.f32 %v926_v10, %v1290_v17  ;;  %v997_v30 = vrot.slane %v978_v18, %v1843_v13 }
 0x243   : > { %v982_v25 = vmax.f32 %v936_v14, %v1292_v21  ;;  %v945_v26 = vcombine.high %v943_v19, %v943_v19  ;;  %v1293_v27 = vrot.slane %v944_v20, 9  ;;  %v1294_v28 = vrot.slane %v943_v19, 9 }
 0x244   : > { %v981_v29 = vmax.f32 %v928_v15, %v1291_v22  ;;  %v1001_v31 = vrot.slane %v979_v23, %v1843_v13  ;;  %v1005_v32 = vrot.slane %v980_v24, %v1843_v13 }
 0x245   : > { %v1295_v33 = vrot.slane %v945_v26, 9  ;;  %v983_v34 = vmax.f32 %v944_v20, %v1293_v27  ;;  %v984_v35 = vmax.f32 %v943_v19, %v1294_v28  ;;  %v1013_v39 = vrot.slane %v982_v25, %v1843_v13 }
 0x246   : > { %v1009_v36 = vrot.slane %v981_v29, %v1843_v13  ;;  %v1027_v37 = vsel %vm1026_vm4, %v1001_v31, %v997_v30 }
 0x247   : > { %v985_v38 = vmax.f32 %v945_v26, %v1295_v33  ;;  %v1029_v40 = vsel %vm1028_vm5, %v1005_v32, %v1027_v37  ;;  %v1017_v41 = vrot.slane %v983_v34, %v1843_v13  ;;  %v1021_v43 = vrot.slane %v984_v35, %v1843_v13 }
 0x248   : > { %v1031_v42 = vsel %vm1030_vm6, %v1009_v36, %v1029_v40 }
 0x249   : > { %v1033_v44 = vsel %vm1032_vm7, %v1013_v39, %v1031_v42  ;;  %v1025_v45 = vrot.slane %v985_v38, %v1843_v13 }
 0x24a   : > { %v1035_v46 = vsel %vm1034_vm8, %v1017_v41, %v1033_v44 }
 0x24b   : > { %v1037_v47 = vsel %vm1036_vm9, %v1021_v43, %v1035_v46 }
 0x24c   : > { %v1039_v48 = vsel %vm1038_vm10, %v1025_v45, %v1037_v47 }
 0x24d   : > { %1041 = vrot.lane.b32.xlu0 %v1039_v48, %s1657_s14 }
 0x2bf   : > { %v1042_v49 = vpop.permute.xlu0 %1041 }
 0x2c0   : > { %v1044_v50 = vcombine.high %v1042_v49, %v1042_v49  ;;  %v1051_v51 = vrot.slane %v1042_v49, %v918_v3 }
 0x2c2   : > { %v1058_v52 = vrot.slane %v1044_v50, %v918_v3  ;;  %v1059_v53 = vcombine.high %v1051_v51, %v1051_v51  ;;  %v1061_v54 = vrot.slane %v1051_v51, 1  ;;  %v1073_v55 = vmax.f32 %v978_v18, %v1051_v51 }
 0x2c4   : > { %v1060_v56 = vcombine.high %v1058_v52, %v1058_v52  ;;  %v1062_v57 = vrot.slane %v1059_v53, 1  ;;  %v1063_v58 = vrot.slane %v1058_v52, 1  ;;  %v1074_v59 = vmax.f32 %v979_v23, %v1061_v54 }
 0x2c5   : > { %v1075_v60 = vmax.f32 %v980_v24, %v1059_v53  ;;  %v1077_v63 = vmax.f32 %v982_v25, %v1058_v52  ;;  %v1092_v2 = vrot.slane %v1073_v55, %v1843_v13 }
 0x2c6   : > { %v1064_v61 = vrot.slane %v1060_v56, 1  ;;  %v1076_v62 = vmax.f32 %v981_v29, %v1062_v57  ;;  %v1078_v1 = vmax.f32 %v983_v34, %v1063_v58  ;;  %v1096_v3 = vrot.slane %v1074_v59, %v1843_v13 }
 0x2c7   : > { %v1100_v4 = vrot.slane %v1075_v60, %v1843_v13  ;;  %v1079_v5 = vmax.f32 %v984_v35, %v1060_v56  ;;  %v1108_v9 = vrot.slane %v1077_v63, %v1843_v13 }
 0x2c8   : > { %v1104_v6 = vrot.slane %v1076_v62, %v1843_v13  ;;  %v1080_v7 = vmax.f32 %v985_v38, %v1064_v61  ;;  %v1121_v8 = vsel %vm1026_vm4, %v1096_v3, %v1092_v2  ;;  %v1112_v11 = vrot.slane %v1078_v1, %v1843_v13 }
 0x2c9   : > { %v1122_v10 = vsel %vm1028_vm5, %v1100_v4, %v1121_v8  ;;  %v1116_v0 = vrot.slane %v1079_v5, %v1843_v13 }
 0x2ca   : > { %v1123_v12 = vsel %vm1030_vm6, %v1104_v6, %v1122_v10  ;;  %v1120_v15 = vrot.slane %v1080_v7, %v1843_v13 }
 0x2cb   : > { %v1124_v14 = vsel %vm1032_vm7, %v1108_v9, %v1123_v12 }
 0x2cc   : > { %v1125_v16 = vsel %vm1034_vm8, %v1112_v11, %v1124_v14 }
 0x2cd   : > { %v1126_v17 = vsel %vm1036_vm9, %v1116_v0, %v1125_v16 }
 0x2ce   : > { %v1127_v18 = vsel %vm1038_vm10, %v1120_v15, %v1126_v17 }
 0x2cf   : > { %1129 = vst [vmem:[%s247_s7] sm:$0xff] %v1127_v18 }
 0x2d0   : > { %1590 = shalt.err (!%p1587_p11)
}
 0x2d1   : > { %s1591_s11 = scalar_lea.hbm %s1881_s8, 128  ;;  %s1595_s14 = scalar_lea.hbm %s1931_s5, 256 }
 0x2d2   : > { %p1592_p13 = scmp.ne.s32.totalorder %s1881_s8, %s1591_s11  ;;  %p1596_p6 = scmp.lt.u32.totalorder %s1881_s8, %s1931_s5 }
 0x2d3   : > { %p1597_p9 = scmp.lt.u32.totalorder %s1595_s14, %s1591_s11  ;;  %p1599_p10 = scmp.lt.u32.totalorder %s1591_s11, %s1881_s8 }
 0x2d4   : > { %p1593_p5 = pnand %p1592_p13, %p1944_p1 }
 0x2d5   : > { %p1598_p12 = por %p1597_p9, %p1596_p6 }
 0x2d6   : > { %p1594_p0 = pneg %p1593_p5 }
 0x2d7   : > { %p1600_p2 = por %p1599_p10, %p1598_p12 }
 0x2d9   : > { %p1601_p3 = pnand %p1600_p2, %p1594_p0 }
 0x2db   : > { %1604 = shalt.err (!%p1601_p3)
}
 0x2dc   : > { %1411 = dma.vmem_to_hbm [thread:$0]  (%p1944_p1), %s1883_s23, 128, %s1881_s8, %s1131_s22  }
 0x2dd PF: > { %p1428_p4 = scmp.ge.s32.totalorder %s1647_s21, 2  ;;  %s1156_s17 = sand.u32 1, %s1635_s18  }
 0x2de   : > { %p1945_p7 = scmp.ne.s32.totalorder %s1936_s29, 0  ;;  %s1157_s7 = scalar_lea.sflag [#allocation5], %s1156_s17 }
 0x2e0   : > { %p1421_p8 = pnand %p1428_p4, %p1945_p7 }
 0x2e2   : > { %1630 = dma.done.wait (!%p1421_p8), %s1157_s7, 128  }
 0x2e3   : > { %1632 = vsyncadd (!%p1421_p8), %s1157_s7, 4294967168  ;;  %p17_p11 = scmp.ge.s32.totalorder %s1714_s24, 4   ;;  %s1946_s18 = smov %s1639_s19 }
 0x2e4   : > { %s1947_s19 = smov %s1643_s20  ;;  %s1948_s20 = smov %s1725_s27 }
 0x2e5   : > { %s1949_s21 = smov %s1714_s24  ;;  %19 = sbr.rel (!%p17_p11) target bundleno = 5 (0x5), region = 84 }
 0x2ec   :  { %1162 = vsyncpa [#allocation4], 1 }
 0x2ed   :  { %1164 = vsyncpa [#allocation4 + $0x1], 1 }
 0x2ee   :  { %1165 = vsyncpa [#allocation7], 1 }
 0x2ef   :  { %1166 = vsyncpa [#allocation5], 1 }
 0x2f0   :  { %1168 = vsyncpa [#allocation5 + $0x1], 1 }

</bundles_post_ra>
